<compile_context>
chip_gen: v6e
topology: v6e:2x2x1
jax: 0.10.0
libtpu: 0.0.40
codegen_flags: <defaults>
</compile_context>

<pallas_src>
import functools

import jax
import jax.numpy as jnp
from jax import lax
from jax.experimental import pallas as pl
from jax.experimental.pallas import tpu as pltpu


def _round_up(x, m):
    return -(-x // m) * m


def _vmem_limit_bytes():
    """Generation-aware scoped-VMEM budget (v5e/v6e: 128 MiB phys, v7x: 64 MiB)."""
    cap = None
    try:
        cap = getattr(pltpu.get_tpu_info(), "vmem_capacity_bytes", None)
    except Exception:
        cap = None
    if not cap:
        cap = 64 * 1024 * 1024  # conservative fallback: assume v7x physical VMEM
    return int(min((cap * 3) // 4, 96 * 1024 * 1024))


def _rnn_recurrence_kernel(x_ref, whh_ref, wfc_ref, bfc_ref, out_ref, h_ref,
                           *, seq_len):
    """One (batch-tile, time-chunk) grid step of the tanh RNN recurrence.

    x_ref   : (TT, BT, Hp)  act_dtype  pre-projected inputs x@W_ih + b (time-major)
    whh_ref : (Hp, Hp)      act_dtype  hidden->hidden weight (transposed vs torch)
    wfc_ref : (Hp, Op)      act_dtype  fc weight (transposed vs torch)
    bfc_ref : (1, Op)       f32        fc bias
    out_ref : (BT, Op)      f32        logits for this batch tile
    h_ref   : (BT, Hp)      f32        hidden-state carry across time chunks
    """
    TT = x_ref.shape[0]
    ti = pl.program_id(1)            # time-chunk index (inner, "arbitrary" axis)

    @pl.when(ti == 0)
    def _init():
        h_ref[...] = jnp.zeros_like(h_ref)

    t0 = ti * TT

    def step(t, h):
        # TODO(synk): park W_hh in the MXU weight registers across the recurrence
        # via pltpu.matmul_push_rhs / matmul_acc_lhs instead of re-feeding it.
        h_new = jnp.tanh(
            x_ref[t].astype(jnp.float32)
            + jnp.dot(h.astype(whh_ref.dtype), whh_ref[...],
                      preferred_element_type=jnp.float32)
        )
        # Time axis is zero-padded up to a multiple of TT; padded steps keep h.
        return jnp.where(t0 + t < seq_len, h_new, h)

    # TODO(synk): interleave 2-4 independent batch sub-tiles per step to fill the
    # MXU/EUP FIFOs once the batch is large (the recurrence is latency-bound).
    h_ref[...] = lax.fori_loop(0, TT, step, h_ref[...], unroll=min(TT, 8))

    @pl.when(ti == pl.num_programs(1) - 1)
    def _finalize():
        out_ref[...] = (
            jnp.dot(h_ref[...].astype(wfc_ref.dtype), wfc_ref[...],
                    preferred_element_type=jnp.float32)
            + bfc_ref[...]
        ).astype(out_ref.dtype)


def sentiment_rnn_forward(x_ids, params, *, act_dtype=jnp.bfloat16):
    """x_ids: (B, T) int32 token ids. Returns (B, O) float32 logits."""
    emb_tbl = params["embedding"]          # (V, E)
    w_ih = params["w_ih"]                  # (E, H)
    w_hh = params["w_hh"]                  # (H, H)
    b = params["b"]                        # (1, H)  = b_ih + b_hh (bias=True in torch)
    w_fc = params["w_fc"]                  # (H, O)
    b_fc = params["b_fc"]                  # (1, O)

    B, T = x_ids.shape
    assert T >= 1, "SentimentRNN forward requires at least one timestep"
    H = w_hh.shape[0]
    O = w_fc.shape[1]

    # Lane/sublane densification: H, O -> multiples of 128 lanes (unmasked
    # stores); B -> multiple of 16 sublanes (native bf16 packed tile).
    Hp = _round_up(H, 128)
    Op = _round_up(O, 128)
    Bp = _round_up(B, 16)

    # Batch tiling: >=2 tiles lets the leading "parallel" grid axis split the
    # batch across v7x's two TensorCores (no effect on v5e/v6e).
    BT = Bp // 2 if Bp >= 32 else Bp
    NB = Bp // BT

    vmem_limit = _vmem_limit_bytes()

    # Time chunking: largest chunk whose double-buffered slab uses <= half the
    # scoped-VMEM budget (bigger chunks on 128 MiB parts, smaller on v7x).
    act_bytes = jnp.dtype(act_dtype).itemsize
    bytes_per_step = BT * Hp * act_bytes
    TT = int(max(1, min(T, (vmem_limit // 2) // (2 * bytes_per_step))))
    NT = -(-T // TT)
    T_pad = NT * TT

    # Input projection hoisted OUT of the kernel (fuses with the gather in XLA):
    # gather time-major -> project -> pad -> cast.  The kernel only ever sees the
    # lane-dense (T_pad, Bp, Hp) projected slab.
    embedded = jnp.take(emb_tbl, x_ids.T, axis=0).astype(jnp.float32)       # (T, B, E)
    x_proj = jnp.einsum("tbe,eh->tbh", embedded, w_ih,
                        preferred_element_type=jnp.float32) + b              # (T, B, H)
    x_proj = jnp.pad(
        x_proj, ((0, T_pad - T), (0, Bp - B), (0, Hp - H))).astype(act_dtype)

    # Zero-padding keeps padded H/O lanes and batch rows identically zero through
    # the recurrence (tanh(0)=0, padded W rows/cols are zero) => real slice exact.
    w_hh_p = jnp.pad(w_hh, ((0, Hp - H), (0, Hp - H))).astype(act_dtype)
    w_fc_p = jnp.pad(w_fc, ((0, Hp - H), (0, Op - O))).astype(act_dtype)
    b_fc_p = jnp.pad(b_fc, ((0, 0), (0, Op - O))).astype(jnp.float32)

    kernel = functools.partial(_rnn_recurrence_kernel, seq_len=T)

    out = pl.pallas_call(
        kernel,
        out_shape=jax.ShapeDtypeStruct((Bp, Op), jnp.float32),
        grid_spec=pltpu.PrefetchScalarGridSpec(
            num_scalar_prefetch=0,
            grid=(NB, NT),
            in_specs=[
                pl.BlockSpec((TT, BT, Hp), lambda bi, ti: (ti, bi, 0)),
                pl.BlockSpec((Hp, Hp), lambda bi, ti: (0, 0)),
                pl.BlockSpec((Hp, Op), lambda bi, ti: (0, 0)),
                pl.BlockSpec((1, Op), lambda bi, ti: (0, 0)),
            ],
            out_specs=pl.BlockSpec((BT, Op), lambda bi, ti: (bi, 0)),
            scratch_shapes=[pltpu.VMEM((BT, Hp), jnp.float32)],
        ),
        compiler_params=pltpu.CompilerParams(
            dimension_semantics=("parallel", "arbitrary"),
            vmem_limit_bytes=vmem_limit,
        ),
    )(x_proj, w_hh_p, w_fc_p, b_fc_p)

    return out[:B, :O]


def sentiment_rnn_reference(x_ids, params):
    """Pure-JAX f32 reference matching torch semantics (for validation)."""
    embedded = jnp.take(params["embedding"], x_ids, axis=0)  # (B, T, E)
    B = embedded.shape[0]
    H = params["w_hh"].shape[0]
    h = jnp.zeros((B, H), jnp.float32)

    def step(h, x_t):
        h_new = jnp.tanh(x_t @ params["w_ih"] + h @ params["w_hh"] + params["b"])
        return h_new, None

    h_last, _ = jax.lax.scan(step, h, jnp.transpose(embedded, (1, 0, 2)))
    return h_last @ params["w_fc"] + params["b_fc"]


def init_params(key, vocab_size, embedding_dim, hidden_dim, output_dim):
    ks = jax.random.split(key, 7)
    scale = 0.1
    return {
        "embedding": scale * jax.random.normal(ks[0], (vocab_size, embedding_dim), jnp.float32),
        # Stored pre-transposed relative to torch's (H, E)/(H, H)/(O, H).
        "w_ih": scale * jax.random.normal(ks[1], (embedding_dim, hidden_dim), jnp.float32),
        "w_hh": scale * jax.random.normal(ks[2], (hidden_dim, hidden_dim), jnp.float32),
        # b = b_ih + b_hh combined (valid because nn.RNN defaults to bias=True).
        "b": scale * jax.random.normal(ks[3], (1, hidden_dim), jnp.float32),
        "w_fc": scale * jax.random.normal(ks[4], (hidden_dim, output_dim), jnp.float32),
        "b_fc": scale * jax.random.normal(ks[5], (1, output_dim), jnp.float32),
    }


if __name__ == "__main__":
    VOCAB, EMB, HID, OUT = 50, 16, 32, 2
    B, T = 2, 8

    key = jax.random.PRNGKey(0)
    pkey, xkey = jax.random.split(key)
    params = init_params(pkey, VOCAB, EMB, HID, OUT)
    x_ids = jax.random.randint(xkey, (B, T), 0, VOCAB, dtype=jnp.int32)

    ref = jax.block_until_ready(sentiment_rnn_reference(x_ids, params))

    # f32 storage path: near-exact vs reference.
    fwd_f32 = jax.jit(functools.partial(sentiment_rnn_forward, act_dtype=jnp.float32))
    logits_f32 = jax.block_until_ready(fwd_f32(x_ids, params))
    assert logits_f32.shape == (B, OUT)
    assert jnp.allclose(logits_f32, ref, atol=1e-4, rtol=1e-4), (logits_f32, ref)

    # Default bf16 storage path (f32 accumulate): looser tolerance.
    fwd = jax.jit(sentiment_rnn_forward)
    logits = jax.block_until_ready(fwd(x_ids, params))
    assert logits.shape == (B, OUT)
    assert jnp.allclose(logits, ref, atol=2e-2, rtol=2e-2), (logits, ref)

    print("KERNEL_OK")
</pallas_src>

<mosaic_0001>
module attributes {stable_mosaic.version = 11 : i64} {
  func.func @_rnn_recurrence_kernel(%arg0: i32, %arg1: i32, %arg2: memref<8x16x128xf32, #tpu.memory_space<vmem>>, %arg3: memref<128x128xf32, #tpu.memory_space<vmem>>, %arg4: memref<128x128xf32, #tpu.memory_space<vmem>>, %arg5: memref<1x128xf32, #tpu.memory_space<vmem>>, %arg6: memref<16x128xf32, #tpu.memory_space<vmem>>, %arg7: memref<16x128xf32, #tpu.memory_space<vmem>>) attributes {dimension_semantics = [#tpu.dimension_semantics<parallel>, #tpu.dimension_semantics<arbitrary>], iteration_bounds = array<i64: 1, 1>, scalar_prefetch = 0 : i64, scratch_operands = 1 : i64, tpu.core_type = #tpu.core_type<tc>, window_params = [{transform_indices = @transform_0, window_bounds = array<i64: 8, 16, 128>}, {pipeline_mode = #tpu.pipeline_mode<synchronous>, transform_indices = @transform_1, window_bounds = array<i64: 128, 128>}, {pipeline_mode = #tpu.pipeline_mode<synchronous>, transform_indices = @transform_2, window_bounds = array<i64: 128, 128>}, {pipeline_mode = #tpu.pipeline_mode<synchronous>, transform_indices = @transform_3, window_bounds = array<i64: 1, 128>}, {transform_indices = @transform_4, window_bounds = array<i64: 16, 128>}]} {
    %c0_i32 = arith.constant 0 : i32
    %0 = arith.cmpi eq, %arg1, %c0_i32 : i32
    %1 = arith.extui %0 : i1 to i32
    %c0_i32_0 = arith.constant 0 : i32
    %2 = arith.cmpi ne, %1, %c0_i32_0 : i32
    scf.if %2 {
      %cst_55 = arith.constant 0.000000e+00 : f32
      %89 = vector.broadcast %cst_55 : f32 to vector<16x128xf32>
      %c0_56 = arith.constant 0 : index
      %c0_57 = arith.constant 0 : index
      %90 = vector.load %arg7[%c0_56, %c0_57] : memref<16x128xf32, #tpu.memory_space<vmem>>, vector<16x128xf32>
      tpu.vector_store %arg7[%c0_56, %c0_57], %89 {strides = array<i32>} : memref<16x128xf32, #tpu.memory_space<vmem>>, vector<16x128xf32>,
    } else {
    }
    %c8_i32 = arith.constant 8 : i32
    %3 = arith.muli %arg1, %c8_i32 : i32
    %c0 = arith.constant 0 : index
    %c0_1 = arith.constant 0 : index
    %4 = vector.load %arg7[%c0, %c0_1] : memref<16x128xf32, #tpu.memory_space<vmem>>, vector<16x128xf32>
    %c0_i32_2 = arith.constant 0 : i32
    %5 = arith.index_cast %c0_i32_2 : i32 to index
    %c0_3 = arith.constant 0 : index
    %c0_4 = arith.constant 0 : index
    %6 = vector.load %arg2[%5, %c0_3, %c0_4] : memref<8x16x128xf32, #tpu.memory_space<vmem>>, vector<1x16x128xf32>
    %7 = vector.shape_cast %6 : vector<1x16x128xf32> to vector<16x128xf32>
    %c0_5 = arith.constant 0 : index
    %c0_6 = arith.constant 0 : index
    %8 = vector.load %arg3[%c0_5, %c0_6] : memref<128x128xf32, #tpu.memory_space<vmem>>, vector<128x128xf32>
    %cst = arith.constant dense<0.000000e+00> : vector<16x128xf32>
    %9 = tpu.matmul %4, %8, %cst {dimension_numbers = #tpu.dot_dimension_numbers<[1], [0], [0], [1], [0, 0, 1, 1], [], []>} : vector<16x128xf32>, vector<128x128xf32>, vector<16x128xf32> -> vector<16x128xf32>
    %10 = arith.addf %7, %9 : vector<16x128xf32>
    %11 = math.tanh %10 : vector<16x128xf32>
    %12 = arith.addi %3, %c0_i32_2 : i32
    %c8_i32_7 = arith.constant 8 : i32
    %13 = arith.cmpi slt, %12, %c8_i32_7 : i32
    %14 = arith.select %13, %11, %4 : vector<16x128xf32>
    %c1_i32 = arith.constant 1 : i32
    %15 = arith.index_cast %c1_i32 : i32 to index
    %c0_8 = arith.constant 0 : index
    %c0_9 = arith.constant 0 : index
    %16 = vector.load %arg2[%15, %c0_8, %c0_9] : memref<8x16x128xf32, #tpu.memory_space<vmem>>, vector<1x16x128xf32>
    %17 = vector.shape_cast %16 : vector<1x16x128xf32> to vector<16x128xf32>
    %c0_10 = arith.constant 0 : index
    %c0_11 = arith.constant 0 : index
    %18 = vector.load %arg3[%c0_10, %c0_11] : memref<128x128xf32, #tpu.memory_space<vmem>>, vector<128x128xf32>
    %cst_12 = arith.constant dense<0.000000e+00> : vector<16x128xf32>
    %19 = tpu.matmul %14, %18, %cst_12 {dimension_numbers = #tpu.dot_dimension_numbers<[1], [0], [0], [1], [0, 0, 1, 1], [], []>} : vector<16x128xf32>, vector<128x128xf32>, vector<16x128xf32> -> vector<16x128xf32>
    %20 = arith.addf %17, %19 : vector<16x128xf32>
    %21 = math.tanh %20 : vector<16x128xf32>
    %22 = arith.addi %3, %c1_i32 : i32
    %c8_i32_13 = arith.constant 8 : i32
    %23 = arith.cmpi slt, %22, %c8_i32_13 : i32
    %24 = arith.select %23, %21, %14 : vector<16x128xf32>
    %c2_i32 = arith.constant 2 : i32
    %25 = arith.index_cast %c2_i32 : i32 to index
    %c0_14 = arith.constant 0 : index
    %c0_15 = arith.constant 0 : index
    %26 = vector.load %arg2[%25, %c0_14, %c0_15] : memref<8x16x128xf32, #tpu.memory_space<vmem>>, vector<1x16x128xf32>
    %27 = vector.shape_cast %26 : vector<1x16x128xf32> to vector<16x128xf32>
    %c0_16 = arith.constant 0 : index
    %c0_17 = arith.constant 0 : index
    %28 = vector.load %arg3[%c0_16, %c0_17] : memref<128x128xf32, #tpu.memory_space<vmem>>, vector<128x128xf32>
    %cst_18 = arith.constant dense<0.000000e+00> : vector<16x128xf32>
    %29 = tpu.matmul %24, %28, %cst_18 {dimension_numbers = #tpu.dot_dimension_numbers<[1], [0], [0], [1], [0, 0, 1, 1], [], []>} : vector<16x128xf32>, vector<128x128xf32>, vector<16x128xf32> -> vector<16x128xf32>
    %30 = arith.addf %27, %29 : vector<16x128xf32>
    %31 = math.tanh %30 : vector<16x128xf32>
    %32 = arith.addi %3, %c2_i32 : i32
    %c8_i32_19 = arith.constant 8 : i32
    %33 = arith.cmpi slt, %32, %c8_i32_19 : i32
    %34 = arith.select %33, %31, %24 : vector<16x128xf32>
    %c3_i32 = arith.constant 3 : i32
    %35 = arith.index_cast %c3_i32 : i32 to index
    %c0_20 = arith.constant 0 : index
    %c0_21 = arith.constant 0 : index
    %36 = vector.load %arg2[%35, %c0_20, %c0_21] : memref<8x16x128xf32, #tpu.memory_space<vmem>>, vector<1x16x128xf32>
    %37 = vector.shape_cast %36 : vector<1x16x128xf32> to vector<16x128xf32>
    %c0_22 = arith.constant 0 : index
    %c0_23 = arith.constant 0 : index
    %38 = vector.load %arg3[%c0_22, %c0_23] : memref<128x128xf32, #tpu.memory_space<vmem>>, vector<128x128xf32>
    %cst_24 = arith.constant dense<0.000000e+00> : vector<16x128xf32>
    %39 = tpu.matmul %34, %38, %cst_24 {dimension_numbers = #tpu.dot_dimension_numbers<[1], [0], [0], [1], [0, 0, 1, 1], [], []>} : vector<16x128xf32>, vector<128x128xf32>, vector<16x128xf32> -> vector<16x128xf32>
    %40 = arith.addf %37, %39 : vector<16x128xf32>
    %41 = math.tanh %40 : vector<16x128xf32>
    %42 = arith.addi %3, %c3_i32 : i32
    %c8_i32_25 = arith.constant 8 : i32
    %43 = arith.cmpi slt, %42, %c8_i32_25 : i32
    %44 = arith.select %43, %41, %34 : vector<16x128xf32>
    %c4_i32 = arith.constant 4 : i32
    %45 = arith.index_cast %c4_i32 : i32 to index
    %c0_26 = arith.constant 0 : index
    %c0_27 = arith.constant 0 : index
    %46 = vector.load %arg2[%45, %c0_26, %c0_27] : memref<8x16x128xf32, #tpu.memory_space<vmem>>, vector<1x16x128xf32>
    %47 = vector.shape_cast %46 : vector<1x16x128xf32> to vector<16x128xf32>
    %c0_28 = arith.constant 0 : index
    %c0_29 = arith.constant 0 : index
    %48 = vector.load %arg3[%c0_28, %c0_29] : memref<128x128xf32, #tpu.memory_space<vmem>>, vector<128x128xf32>
    %cst_30 = arith.constant dense<0.000000e+00> : vector<16x128xf32>
    %49 = tpu.matmul %44, %48, %cst_30 {dimension_numbers = #tpu.dot_dimension_numbers<[1], [0], [0], [1], [0, 0, 1, 1], [], []>} : vector<16x128xf32>, vector<128x128xf32>, vector<16x128xf32> -> vector<16x128xf32>
    %50 = arith.addf %47, %49 : vector<16x128xf32>
    %51 = math.tanh %50 : vector<16x128xf32>
    %52 = arith.addi %3, %c4_i32 : i32
    %c8_i32_31 = arith.constant 8 : i32
    %53 = arith.cmpi slt, %52, %c8_i32_31 : i32
    %54 = arith.select %53, %51, %44 : vector<16x128xf32>
    %c5_i32 = arith.constant 5 : i32
    %55 = arith.index_cast %c5_i32 : i32 to index
    %c0_32 = arith.constant 0 : index
    %c0_33 = arith.constant 0 : index
    %56 = vector.load %arg2[%55, %c0_32, %c0_33] : memref<8x16x128xf32, #tpu.memory_space<vmem>>, vector<1x16x128xf32>
    %57 = vector.shape_cast %56 : vector<1x16x128xf32> to vector<16x128xf32>
    %c0_34 = arith.constant 0 : index
    %c0_35 = arith.constant 0 : index
    %58 = vector.load %arg3[%c0_34, %c0_35] : memref<128x128xf32, #tpu.memory_space<vmem>>, vector<128x128xf32>
    %cst_36 = arith.constant dense<0.000000e+00> : vector<16x128xf32>
    %59 = tpu.matmul %54, %58, %cst_36 {dimension_numbers = #tpu.dot_dimension_numbers<[1], [0], [0], [1], [0, 0, 1, 1], [], []>} : vector<16x128xf32>, vector<128x128xf32>, vector<16x128xf32> -> vector<16x128xf32>
    %60 = arith.addf %57, %59 : vector<16x128xf32>
    %61 = math.tanh %60 : vector<16x128xf32>
    %62 = arith.addi %3, %c5_i32 : i32
    %c8_i32_37 = arith.constant 8 : i32
    %63 = arith.cmpi slt, %62, %c8_i32_37 : i32
    %64 = arith.select %63, %61, %54 : vector<16x128xf32>
    %c6_i32 = arith.constant 6 : i32
    %65 = arith.index_cast %c6_i32 : i32 to index
    %c0_38 = arith.constant 0 : index
    %c0_39 = arith.constant 0 : index
    %66 = vector.load %arg2[%65, %c0_38, %c0_39] : memref<8x16x128xf32, #tpu.memory_space<vmem>>, vector<1x16x128xf32>
    %67 = vector.shape_cast %66 : vector<1x16x128xf32> to vector<16x128xf32>
    %c0_40 = arith.constant 0 : index
    %c0_41 = arith.constant 0 : index
    %68 = vector.load %arg3[%c0_40, %c0_41] : memref<128x128xf32, #tpu.memory_space<vmem>>, vector<128x128xf32>
    %cst_42 = arith.constant dense<0.000000e+00> : vector<16x128xf32>
    %69 = tpu.matmul %64, %68, %cst_42 {dimension_numbers = #tpu.dot_dimension_numbers<[1], [0], [0], [1], [0, 0, 1, 1], [], []>} : vector<16x128xf32>, vector<128x128xf32>, vector<16x128xf32> -> vector<16x128xf32>
    %70 = arith.addf %67, %69 : vector<16x128xf32>
    %71 = math.tanh %70 : vector<16x128xf32>
    %72 = arith.addi %3, %c6_i32 : i32
    %c8_i32_43 = arith.constant 8 : i32
    %73 = arith.cmpi slt, %72, %c8_i32_43 : i32
    %74 = arith.select %73, %71, %64 : vector<16x128xf32>
    %c7_i32 = arith.constant 7 : i32
    %75 = arith.index_cast %c7_i32 : i32 to index
    %c0_44 = arith.constant 0 : index
    %c0_45 = arith.constant 0 : index
    %76 = vector.load %arg2[%75, %c0_44, %c0_45] : memref<8x16x128xf32, #tpu.memory_space<vmem>>, vector<1x16x128xf32>
    %77 = vector.shape_cast %76 : vector<1x16x128xf32> to vector<16x128xf32>
    %c0_46 = arith.constant 0 : index
    %c0_47 = arith.constant 0 : index
    %78 = vector.load %arg3[%c0_46, %c0_47] : memref<128x128xf32, #tpu.memory_space<vmem>>, vector<128x128xf32>
    %cst_48 = arith.constant dense<0.000000e+00> : vector<16x128xf32>
    %79 = tpu.matmul %74, %78, %cst_48 {dimension_numbers = #tpu.dot_dimension_numbers<[1], [0], [0], [1], [0, 0, 1, 1], [], []>} : vector<16x128xf32>, vector<128x128xf32>, vector<16x128xf32> -> vector<16x128xf32>
    %80 = arith.addf %77, %79 : vector<16x128xf32>
    %81 = math.tanh %80 : vector<16x128xf32>
    %82 = arith.addi %3, %c7_i32 : i32
    %c8_i32_49 = arith.constant 8 : i32
    %83 = arith.cmpi slt, %82, %c8_i32_49 : i32
    %84 = arith.select %83, %81, %74 : vector<16x128xf32>
    %c8_i32_50 = arith.constant 8 : i32
    %c0_51 = arith.constant 0 : index
    %c0_52 = arith.constant 0 : index
    %85 = vector.load %arg7[%c0_51, %c0_52] : memref<16x128xf32, #tpu.memory_space<vmem>>, vector<16x128xf32>
    tpu.vector_store %arg7[%c0_51, %c0_52], %84 {strides = array<i32>} : memref<16x128xf32, #tpu.memory_space<vmem>>, vector<16x128xf32>,
    %c0_i32_53 = arith.constant 0 : i32
    %86 = arith.cmpi eq, %arg1, %c0_i32_53 : i32
    %87 = arith.extui %86 : i1 to i32
    %c0_i32_54 = arith.constant 0 : i32
    %88 = arith.cmpi ne, %87, %c0_i32_54 : i32
    scf.if %88 {
      %c0_55 = arith.constant 0 : index
      %c0_56 = arith.constant 0 : index
      %89 = vector.load %arg7[%c0_55, %c0_56] : memref<16x128xf32, #tpu.memory_space<vmem>>, vector<16x128xf32>
      %c0_57 = arith.constant 0 : index
      %c0_58 = arith.constant 0 : index
      %90 = vector.load %arg4[%c0_57, %c0_58] : memref<128x128xf32, #tpu.memory_space<vmem>>, vector<128x128xf32>
      %cst_59 = arith.constant dense<0.000000e+00> : vector<16x128xf32>
      %91 = tpu.matmul %89, %90, %cst_59 {dimension_numbers = #tpu.dot_dimension_numbers<[1], [0], [0], [1], [0, 0, 1, 1], [], []>} : vector<16x128xf32>, vector<128x128xf32>, vector<16x128xf32> -> vector<16x128xf32>
      %c0_60 = arith.constant 0 : index
      %c0_61 = arith.constant 0 : index
      %92 = vector.load %arg5[%c0_60, %c0_61] : memref<1x128xf32, #tpu.memory_space<vmem>>, vector<1x128xf32>
      %93 = vector.broadcast %92 : vector<1x128xf32> to vector<16x128xf32>
      %94 = arith.addf %91, %93 : vector<16x128xf32>
      %c0_62 = arith.constant 0 : index
      %c0_63 = arith.constant 0 : index
      %95 = vector.load %arg6[%c0_62, %c0_63] : memref<16x128xf32, #tpu.memory_space<vmem>>, vector<16x128xf32>
      tpu.vector_store %arg6[%c0_62, %c0_63], %94 {strides = array<i32>} : memref<16x128xf32, #tpu.memory_space<vmem>>, vector<16x128xf32>,
    } else {
    }
    return
  }
  func.func @transform_0(%arg0: i32, %arg1: i32) -> (i32, i32, i32) {
    %c0_i32 = arith.constant 0 : i32
    %c0_i32_0 = arith.constant 0 : i32
    return %arg1, %arg0, %c0_i32 : i32, i32, i32
  }
  func.func @transform_1(%arg0: i32, %arg1: i32) -> (i32, i32) {
    %c0_i32 = arith.constant 0 : i32
    %c0_i32_0 = arith.constant 0 : i32
    %c0_i32_1 = arith.constant 0 : i32
    return %c0_i32, %c0_i32_0 : i32, i32
  }
  func.func @transform_2(%arg0: i32, %arg1: i32) -> (i32, i32) {
    %c0_i32 = arith.constant 0 : i32
    %c0_i32_0 = arith.constant 0 : i32
    %c0_i32_1 = arith.constant 0 : i32
    return %c0_i32, %c0_i32_0 : i32, i32
  }
  func.func @transform_3(%arg0: i32, %arg1: i32) -> (i32, i32) {
    %c0_i32 = arith.constant 0 : i32
    %c0_i32_0 = arith.constant 0 : i32
    %c0_i32_1 = arith.constant 0 : i32
    return %c0_i32, %c0_i32_0 : i32, i32
  }
  func.func @transform_4(%arg0: i32, %arg1: i32) -> (i32, i32) {
    %c0_i32 = arith.constant 0 : i32
    %c0_i32_0 = arith.constant 0 : i32
    return %arg0, %c0_i32 : i32, i32
  }
}

</mosaic_0001>

<bundles_post_ra>
// kernel: sentiment_rnn_forward.1
= control target key start
LH: loop header
LB: loop body
LE: loop exit
PB: predicated region body
PF: predicated region fallthrough
CT: control target
= control target key end

     0   :  { %v1388_v2 = vmov 0.0   ;;  %s1857_s1 = inlined_call_operand.vmem [shape: f32[128,128], index: 1, kind: input, shape index: {}]   ;;  %s1858_s0 = inlined_call_operand.vmem [shape: f32[8,16,128], index: 0, kind: input, shape index: {}]   ;;  %s1859_s2 = inlined_call_operand.vmem [shape: f32[128,128], index: 2, kind: input, shape index: {}]   ;;  %s1860_s3 = inlined_call_operand.vmem [shape: f32[1,128], index: 3, kind: input, shape index: {}]   ;;  %s1861_s4 = inlined_call_operand.vmem [shape: f32[16,128], index: 4, kind: output, shape index: {}]  }
   0x1   :  { %v1417_v0 = vld [vmem:[%s1857_s1 + $0x78] sm:$0xff]  ;;  %v1422_v1 = vld [vmem:[%s1857_s1 + $0x70] sm:$0xff]  ;;  %1072 = vmatprep.mubr.f32.mxu0 %v1388_v2  ;;  %v1431_v3 = vld [vmem:[%s1857_s1 + $0x68] sm:$0xff] }
   0x2   :  { %1040 = vmatprep.subr.mxu0 %v1417_v0  ;;  %1075 = vmatprep.subr.mxu1 %v1417_v0  ;;  %v1440_v4 = vld [vmem:[%s1857_s1 + $0x60] sm:$0xff]  ;;  %v1449_v5 = vld [vmem:[%s1857_s1 + $0x58] sm:$0xff]  ;;  %v1458_v6 = vld [vmem:[%s1857_s1 + $0x50] sm:$0xff] }
   0x3   :  { %1041 = vmatpush3.msra.mxu0 %v1417_v0  ;;  %1076 = vmatpush3.msra.mxu1 %v1417_v0  ;;  %v1467_v7 = vld [vmem:[%s1857_s1 + $0x48] sm:$0xff]  ;;  %v1476_v8 = vld [vmem:[%s1857_s1 + $0x40] sm:$0xff]  ;;  %v1485_v9 = vld [vmem:[%s1857_s1 + $0x38] sm:$0xff] }
   0x4   :  { %1042 = vmatprep.subr.mxu0 %v1422_v1  ;;  %1077 = vmatprep.subr.mxu1 %v1422_v1  ;;  %v1494_v10 = vld [vmem:[%s1857_s1 + $0x30] sm:$0xff]  ;;  %v1503_v11 = vld [vmem:[%s1857_s1 + $0x28] sm:$0xff]  ;;  %v1512_v12 = vld [vmem:[%s1857_s1 + $0x20] sm:$0xff] }
   0x5   :  { %1043 = vmatpush3.msra.mxu0 %v1422_v1  ;;  %1078 = vmatpush3.msra.mxu1 %v1422_v1  ;;  %v1521_v13 = vld [vmem:[%s1857_s1 + $0x18] sm:$0xff]  ;;  %v1530_v14 = vld [vmem:[%s1857_s1 + $0x10] sm:$0xff]  ;;  %v1539_v15 = vld [vmem:[%s1857_s1 + $0x8] sm:$0xff] }
   0x6   :  { %1044 = vmatprep.subr.mxu0 %v1431_v3  ;;  %1079 = vmatprep.subr.mxu1 %v1431_v3  ;;  %v1548_v16 = vld [vmem:[%s1857_s1] sm:$0xff]  ;;  %v27_v17 = vld [vmem:[%s1858_s0 + $0x8] sm:$0xff]  ;;  %v864_v25 = vld [vmem:[%s1858_s0 + $0x18] sm:$0xff] }
   0x7   :  { %1045 = vmatpush3.msra.mxu0 %v1431_v3  ;;  %1080 = vmatpush3.msra.mxu1 %v1431_v3  ;;  %v26_v19 = vld [vmem:[%s1858_s0] sm:$0xff]  ;;  %v863_v27 = vld [vmem:[%s1858_s0 + $0x10] sm:$0xff]  ;;  %v866_v33 = vld [vmem:[%s1858_s0 + $0x28] sm:$0xff] }
   0x8   :  { %1046 = vmatprep.subr.mxu0 %v1440_v4  ;;  %1081 = vmatprep.subr.mxu1 %v1440_v4  ;;  %v865_v35 = vld [vmem:[%s1858_s0 + $0x20] sm:$0xff]  ;;  %v868_v41 = vld [vmem:[%s1858_s0 + $0x38] sm:$0xff]  ;;  %v867_v43 = vld [vmem:[%s1858_s0 + $0x30] sm:$0xff] }
   0x9   :  { %1047 = vmatpush3.msra.mxu0 %v1440_v4  ;;  %1082 = vmatpush3.msra.mxu1 %v1440_v4  ;;  %v870_v49 = vld [vmem:[%s1858_s0 + $0x48] sm:$0xff]  ;;  %v869_v51 = vld [vmem:[%s1858_s0 + $0x40] sm:$0xff]  ;;  %v872_v57 = vld [vmem:[%s1858_s0 + $0x58] sm:$0xff] }
   0xa   :  { %1048 = vmatprep.subr.mxu0 %v1449_v5  ;;  %1083 = vmatprep.subr.mxu1 %v1449_v5  ;;  %v871_v59 = vld [vmem:[%s1858_s0 + $0x50] sm:$0xff] }
   0xb   :  { %1049 = vmatpush3.msra.mxu0 %v1449_v5  ;;  %1084 = vmatpush3.msra.mxu1 %v1449_v5 }
   0xc   :  { %1050 = vmatprep.subr.mxu0 %v1458_v6  ;;  %1085 = vmatprep.subr.mxu1 %v1458_v6 }
   0xd   :  { %1051 = vmatpush3.msra.mxu0 %v1458_v6  ;;  %1086 = vmatpush3.msra.mxu1 %v1458_v6 }
   0xe   :  { %1052 = vmatprep.subr.mxu0 %v1467_v7  ;;  %1087 = vmatprep.subr.mxu1 %v1467_v7 }
   0xf   :  { %1053 = vmatpush3.msra.mxu0 %v1467_v7  ;;  %1088 = vmatpush3.msra.mxu1 %v1467_v7 }
  0x10   :  { %1054 = vmatprep.subr.mxu0 %v1476_v8  ;;  %1089 = vmatprep.subr.mxu1 %v1476_v8 }
  0x11   :  { %1055 = vmatpush3.msra.mxu0 %v1476_v8  ;;  %1090 = vmatpush3.msra.mxu1 %v1476_v8 }
  0x12   :  { %1056 = vmatprep.subr.mxu0 %v1485_v9  ;;  %1091 = vmatprep.subr.mxu1 %v1485_v9 }
  0x13   :  { %1057 = vmatpush3.msra.mxu0 %v1485_v9  ;;  %1092 = vmatpush3.msra.mxu1 %v1485_v9 }
  0x14   :  { %1058 = vmatprep.subr.mxu0 %v1494_v10  ;;  %1093 = vmatprep.subr.mxu1 %v1494_v10 }
  0x15   :  { %1059 = vmatpush3.msra.mxu0 %v1494_v10  ;;  %1094 = vmatpush3.msra.mxu1 %v1494_v10 }
  0x16   :  { %1060 = vmatprep.subr.mxu0 %v1503_v11  ;;  %1095 = vmatprep.subr.mxu1 %v1503_v11 }
  0x17   :  { %1061 = vmatpush3.msra.mxu0 %v1503_v11  ;;  %1096 = vmatpush3.msra.mxu1 %v1503_v11 }
  0x18   :  { %1062 = vmatprep.subr.mxu0 %v1512_v12  ;;  %1097 = vmatprep.subr.mxu1 %v1512_v12 }
  0x19   :  { %1063 = vmatpush3.msra.mxu0 %v1512_v12  ;;  %1098 = vmatpush3.msra.mxu1 %v1512_v12 }
  0x1a   :  { %1064 = vmatprep.subr.mxu0 %v1521_v13  ;;  %1099 = vmatprep.subr.mxu1 %v1521_v13 }
  0x1b   :  { %1065 = vmatpush3.msra.mxu0 %v1521_v13  ;;  %1100 = vmatpush3.msra.mxu1 %v1521_v13 }
  0x1c   :  { %1066 = vmatprep.subr.mxu0 %v1530_v14  ;;  %1101 = vmatprep.subr.mxu1 %v1530_v14 }
  0x1d   :  { %1067 = vmatpush3.msra.mxu0 %v1530_v14  ;;  %1102 = vmatpush3.msra.mxu1 %v1530_v14 }
  0x1e   :  { %1068 = vmatprep.subr.mxu0 %v1539_v15  ;;  %1103 = vmatprep.subr.mxu1 %v1539_v15 }
  0x1f   :  { %1069 = vmatpush3.msra.mxu0 %v1539_v15  ;;  %1104 = vmatpush3.msra.mxu1 %v1539_v15 }
  0x20   :  { %1070 = vmatprep.subr.mxu0 %v1548_v16  ;;  %1105 = vmatprep.subr.mxu1 %v1548_v16 }
  0x21   :  { %1071 = vmatpush3.msra.mxu0 %v1548_v16  ;;  %1106 = vmatpush3.msra.mxu1 %v1548_v16 }
  0x22   :  { %1073 = vmatmul.mubr.f32.vlgmr.msra.gmra.mxu0 %v1388_v2  ;;  %1110 = vmatprep.subr.mxu0 %v1417_v0  ;;  %v773_v2 = vld [vmem:[%s1859_s2 + $0x70] sm:$0xff] }
  0x23   :  { %1111 = vmatpush3.msra.mxu0 %v1417_v0  ;;  %1145 = vmatprep.subr.mxu1 %v1417_v0 }
  0x24   :  { %1112 = vmatprep.subr.mxu0 %v1422_v1 }
  0x25   :  { %1113 = vmatpush3.msra.mxu0 %v1422_v1 }
  0x26   :  { %1114 = vmatprep.subr.mxu0 %v1431_v3 }
  0x27   :  { %1115 = vmatpush3.msra.mxu0 %v1431_v3 }
  0x28   :  { %1116 = vmatprep.subr.mxu0 %v1440_v4 }
  0x29   :  { %1117 = vmatpush3.msra.mxu0 %v1440_v4 }
  0x2a   :  { %1118 = vmatprep.subr.mxu0 %v1449_v5 }
  0x2b   :  { %1119 = vmatpush3.msra.mxu0 %v1449_v5 }
  0x2c   :  { %1120 = vmatprep.subr.mxu0 %v1458_v6 }
  0x2d   :  { %1121 = vmatpush3.msra.mxu0 %v1458_v6 }
  0x2e   :  { %1122 = vmatprep.subr.mxu0 %v1467_v7 }
  0x2f   :  { %1123 = vmatpush3.msra.mxu0 %v1467_v7 }
  0x30   :  { %1124 = vmatprep.subr.mxu0 %v1476_v8 }
  0x31   :  { %1125 = vmatpush3.msra.mxu0 %v1476_v8 }
  0x32   :  { %1126 = vmatprep.subr.mxu0 %v1485_v9 }
  0x33   :  { %1127 = vmatpush3.msra.mxu0 %v1485_v9 }
  0x34   :  { %1128 = vmatprep.subr.mxu0 %v1494_v10 }
  0x35   :  { %1129 = vmatpush3.msra.mxu0 %v1494_v10 }
  0x36   :  { %1130 = vmatprep.subr.mxu0 %v1503_v11 }
  0x37   :  { %1131 = vmatpush3.msra.mxu0 %v1503_v11 }
  0x38   :  { %1132 = vmatprep.subr.mxu0 %v1512_v12 }
  0x39   :  { %1133 = vmatpush3.msra.mxu0 %v1512_v12 }
  0x3a   :  { %1134 = vmatprep.subr.mxu0 %v1521_v13 }
  0x3b   :  { %1135 = vmatpush3.msra.mxu0 %v1521_v13 }
  0x3c   :  { %1136 = vmatprep.subr.mxu0 %v1530_v14 }
  0x3d   :  { %1137 = vmatpush3.msra.mxu0 %v1530_v14 }
  0x3e   :  { %1138 = vmatprep.subr.mxu0 %v1539_v15 }
  0x3f   :  { %1139 = vmatpush3.msra.mxu0 %v1539_v15 }
  0x40   :  { %1140 = vmatprep.subr.mxu0 %v1548_v16 }
  0x41   :  { %1141 = vmatpush3.msra.mxu0 %v1548_v16 }
  0x42   :  { %1180 = vmatprep.subr.mxu0 %v1417_v0 }
  0xe2   :  { %v1074_v18 = vpop.f32.mrf.mxu0 }
  0xe3   :  { %v120_v20 = vadd.f32 %v1074_v18, %v27_v17  ;;  %v766_v17 = vld [vmem:[%s1859_s2 + $0x38] sm:$0xff]  ;;  %v765_v18 = vld [vmem:[%s1859_s2 + $0x30] sm:$0xff] }
  0xe4   :  { %v110_v21 = vpop.f32.mrf.mxu0 }
  0xe5   :  { %v119_v22 = vadd.f32 %v110_v21, %v26_v19  ;;  %v764_v19 = vld [vmem:[%s1859_s2 + $0x28] sm:$0xff]  ;;  %v762_v21 = vld [vmem:[%s1859_s2 + $0x18] sm:$0xff] }
  0xe7   :  { %1356 = vtanh.f32 %v119_v22  ;;  %v761_v22 = vld [vmem:[%s1859_s2 + $0x10] sm:$0xff] }
  0xe8   :  { %1358 = vtanh.f32 %v120_v20  ;;  %v763_v20 = vld [vmem:[%s1859_s2 + $0x20] sm:$0xff] }
  0xf4   :  { %v1357_v23 = vpop.eup %1356 }
  0xf5   :  { %v1359_v24 = vpop.eup %1358  ;;  %1107 = vmatprep.mubr.f32.mxu1 %v1357_v23  ;;  %v760_v23 = vld [vmem:[%s1859_s2 + $0x8] sm:$0xff] }
  0xf6   :  { %1108 = vmatmul.mubr.f32.vlgmr.msra.gmra.mxu1 %v1359_v24  ;;  %v759_v24 = vld [vmem:[%s1859_s2] sm:$0xff] }
  0xf7   :  { %1146 = vmatpush3.msra.mxu1 %v1417_v0 }
  0xf8   :  { %1147 = vmatprep.subr.mxu1 %v1422_v1 }
  0xf9   :  { %1148 = vmatpush3.msra.mxu1 %v1422_v1 }
  0xfa   :  { %1149 = vmatprep.subr.mxu1 %v1431_v3 }
  0xfb   :  { %1150 = vmatpush3.msra.mxu1 %v1431_v3 }
  0xfc   :  { %1151 = vmatprep.subr.mxu1 %v1440_v4 }
  0xfd   :  { %1152 = vmatpush3.msra.mxu1 %v1440_v4 }
  0xfe   :  { %1153 = vmatprep.subr.mxu1 %v1449_v5 }
  0xff   :  { %1154 = vmatpush3.msra.mxu1 %v1449_v5 }
 0x100   :  { %1155 = vmatprep.subr.mxu1 %v1458_v6 }
 0x101   :  { %1156 = vmatpush3.msra.mxu1 %v1458_v6 }
 0x102   :  { %1157 = vmatprep.subr.mxu1 %v1467_v7 }
 0x103   :  { %1158 = vmatpush3.msra.mxu1 %v1467_v7 }
 0x104   :  { %1159 = vmatprep.subr.mxu1 %v1476_v8 }
 0x105   :  { %1160 = vmatpush3.msra.mxu1 %v1476_v8 }
 0x106   :  { %1161 = vmatprep.subr.mxu1 %v1485_v9 }
 0x107   :  { %1162 = vmatpush3.msra.mxu1 %v1485_v9 }
 0x108   :  { %1163 = vmatprep.subr.mxu1 %v1494_v10 }
 0x109   :  { %1164 = vmatpush3.msra.mxu1 %v1494_v10 }
 0x10a   :  { %1165 = vmatprep.subr.mxu1 %v1503_v11 }
 0x10b   :  { %1166 = vmatpush3.msra.mxu1 %v1503_v11 }
 0x10c   :  { %1167 = vmatprep.subr.mxu1 %v1512_v12 }
 0x10d   :  { %1168 = vmatpush3.msra.mxu1 %v1512_v12 }
 0x10e   :  { %1169 = vmatprep.subr.mxu1 %v1521_v13 }
 0x10f   :  { %1170 = vmatpush3.msra.mxu1 %v1521_v13 }
 0x110   :  { %1171 = vmatprep.subr.mxu1 %v1530_v14 }
 0x111   :  { %1172 = vmatpush3.msra.mxu1 %v1530_v14 }
 0x112   :  { %1173 = vmatprep.subr.mxu1 %v1539_v15 }
 0x113   :  { %1174 = vmatpush3.msra.mxu1 %v1539_v15 }
 0x114   :  { %1175 = vmatprep.subr.mxu1 %v1548_v16 }
 0x115   :  { %1176 = vmatpush3.msra.mxu1 %v1548_v16 }
 0x116   :  { %1215 = vmatprep.subr.mxu1 %v1417_v0 }
 0x1b6   :  { %v1109_v26 = vpop.f32.mrf.mxu1 }
 0x1b7   :  { %v208_v28 = vadd.f32 %v1109_v26, %v864_v25  ;;  %v876_v25 = vld [vmem:[%s1858_s0 + $0x78] sm:$0xff] }
 0x1b8   :  { %v198_v29 = vpop.f32.mrf.mxu1 }
 0x1b9   :  { %v207_v30 = vadd.f32 %v863_v27, %v198_v29  ;;  %v875_v27 = vld [vmem:[%s1858_s0 + $0x70] sm:$0xff] }
 0x1bb   :  { %1360 = vtanh.f32 %v207_v30 }
 0x1bc   :  { %1362 = vtanh.f32 %v208_v28 }
 0x1c8   :  { %v1361_v31 = vpop.eup %1360 }
 0x1c9   :  { %v1363_v32 = vpop.eup %1362  ;;  %1142 = vmatprep.mubr.f32.mxu0 %v1361_v31 }
 0x1ca   :  { %1143 = vmatmul.mubr.f32.vlgmr.msra.gmra.mxu0 %v1363_v32 }
 0x1cb   :  { %1181 = vmatpush3.msra.mxu0 %v1417_v0 }
 0x1cc   :  { %1182 = vmatprep.subr.mxu0 %v1422_v1 }
 0x1cd   :  { %1183 = vmatpush3.msra.mxu0 %v1422_v1 }
 0x1ce   :  { %1184 = vmatprep.subr.mxu0 %v1431_v3 }
 0x1cf   :  { %1185 = vmatpush3.msra.mxu0 %v1431_v3 }
 0x1d0   :  { %1186 = vmatprep.subr.mxu0 %v1440_v4 }
 0x1d1   :  { %1187 = vmatpush3.msra.mxu0 %v1440_v4 }
 0x1d2   :  { %1188 = vmatprep.subr.mxu0 %v1449_v5 }
 0x1d3   :  { %1189 = vmatpush3.msra.mxu0 %v1449_v5 }
 0x1d4   :  { %1190 = vmatprep.subr.mxu0 %v1458_v6 }
 0x1d5   :  { %1191 = vmatpush3.msra.mxu0 %v1458_v6 }
 0x1d6   :  { %1192 = vmatprep.subr.mxu0 %v1467_v7 }
 0x1d7   :  { %1193 = vmatpush3.msra.mxu0 %v1467_v7 }
 0x1d8   :  { %1194 = vmatprep.subr.mxu0 %v1476_v8 }
 0x1d9   :  { %1195 = vmatpush3.msra.mxu0 %v1476_v8 }
 0x1da   :  { %1196 = vmatprep.subr.mxu0 %v1485_v9 }
 0x1db   :  { %1197 = vmatpush3.msra.mxu0 %v1485_v9 }
 0x1dc   :  { %1198 = vmatprep.subr.mxu0 %v1494_v10 }
 0x1dd   :  { %1199 = vmatpush3.msra.mxu0 %v1494_v10 }
 0x1de   :  { %1200 = vmatprep.subr.mxu0 %v1503_v11 }
 0x1df   :  { %1201 = vmatpush3.msra.mxu0 %v1503_v11 }
 0x1e0   :  { %1202 = vmatprep.subr.mxu0 %v1512_v12 }
 0x1e1   :  { %1203 = vmatpush3.msra.mxu0 %v1512_v12 }
 0x1e2   :  { %1204 = vmatprep.subr.mxu0 %v1521_v13 }
 0x1e3   :  { %1205 = vmatpush3.msra.mxu0 %v1521_v13 }
 0x1e4   :  { %1206 = vmatprep.subr.mxu0 %v1530_v14 }
 0x1e5   :  { %1207 = vmatpush3.msra.mxu0 %v1530_v14 }
 0x1e6   :  { %1208 = vmatprep.subr.mxu0 %v1539_v15 }
 0x1e7   :  { %1209 = vmatpush3.msra.mxu0 %v1539_v15 }
 0x1e8   :  { %1210 = vmatprep.subr.mxu0 %v1548_v16 }
 0x1e9   :  { %1211 = vmatpush3.msra.mxu0 %v1548_v16 }
 0x1ea   :  { %1250 = vmatprep.subr.mxu0 %v1417_v0 }
 0x28a   :  { %v1144_v34 = vpop.f32.mrf.mxu0 }
 0x28b   :  { %v297_v36 = vadd.f32 %v1144_v34, %v866_v33  ;;  %v877_v33 = vld [vmem:[%s1860_s3] ss:$0 sm:$0xff] }
 0x28c   :  { %v287_v37 = vpop.f32.mrf.mxu0 }
 0x28d   :  { %v296_v38 = vadd.f32 %v865_v35, %v287_v37 }
 0x28f   :  { %1364 = vtanh.f32 %v296_v38 }
 0x290   :  { %1366 = vtanh.f32 %v297_v36 }
 0x29c   :  { %v1365_v39 = vpop.eup %1364 }
 0x29d   :  { %v1367_v40 = vpop.eup %1366  ;;  %1177 = vmatprep.mubr.f32.mxu1 %v1365_v39 }
 0x29e   :  { %1178 = vmatmul.mubr.f32.vlgmr.msra.gmra.mxu1 %v1367_v40 }
 0x29f   :  { %1216 = vmatpush3.msra.mxu1 %v1417_v0 }
 0x2a0   :  { %1217 = vmatprep.subr.mxu1 %v1422_v1 }
 0x2a1   :  { %1218 = vmatpush3.msra.mxu1 %v1422_v1 }
 0x2a2   :  { %1219 = vmatprep.subr.mxu1 %v1431_v3 }
 0x2a3   :  { %1220 = vmatpush3.msra.mxu1 %v1431_v3 }
 0x2a4   :  { %1221 = vmatprep.subr.mxu1 %v1440_v4 }
 0x2a5   :  { %1222 = vmatpush3.msra.mxu1 %v1440_v4 }
 0x2a6   :  { %1223 = vmatprep.subr.mxu1 %v1449_v5 }
 0x2a7   :  { %1224 = vmatpush3.msra.mxu1 %v1449_v5 }
 0x2a8   :  { %1225 = vmatprep.subr.mxu1 %v1458_v6 }
 0x2a9   :  { %1226 = vmatpush3.msra.mxu1 %v1458_v6 }
 0x2aa   :  { %1227 = vmatprep.subr.mxu1 %v1467_v7 }
 0x2ab   :  { %1228 = vmatpush3.msra.mxu1 %v1467_v7 }
 0x2ac   :  { %1229 = vmatprep.subr.mxu1 %v1476_v8 }
 0x2ad   :  { %1230 = vmatpush3.msra.mxu1 %v1476_v8 }
 0x2ae   :  { %1231 = vmatprep.subr.mxu1 %v1485_v9 }
 0x2af   :  { %1232 = vmatpush3.msra.mxu1 %v1485_v9 }
 0x2b0   :  { %1233 = vmatprep.subr.mxu1 %v1494_v10 }
 0x2b1   :  { %1234 = vmatpush3.msra.mxu1 %v1494_v10 }
 0x2b2   :  { %1235 = vmatprep.subr.mxu1 %v1503_v11 }
 0x2b3   :  { %1236 = vmatpush3.msra.mxu1 %v1503_v11 }
 0x2b4   :  { %1237 = vmatprep.subr.mxu1 %v1512_v12 }
 0x2b5   :  { %1238 = vmatpush3.msra.mxu1 %v1512_v12 }
 0x2b6   :  { %1239 = vmatprep.subr.mxu1 %v1521_v13 }
 0x2b7   :  { %1240 = vmatpush3.msra.mxu1 %v1521_v13 }
 0x2b8   :  { %1241 = vmatprep.subr.mxu1 %v1530_v14 }
 0x2b9   :  { %1242 = vmatpush3.msra.mxu1 %v1530_v14 }
 0x2ba   :  { %1243 = vmatprep.subr.mxu1 %v1539_v15 }
 0x2bb   :  { %1244 = vmatpush3.msra.mxu1 %v1539_v15 }
 0x2bc   :  { %1245 = vmatprep.subr.mxu1 %v1548_v16 }
 0x2bd   :  { %1246 = vmatpush3.msra.mxu1 %v1548_v16 }
 0x2be   :  { %1285 = vmatprep.subr.mxu1 %v1417_v0 }
 0x35e   :  { %v1179_v42 = vpop.f32.mrf.mxu1 }
 0x35f   :  { %v386_v44 = vadd.f32 %v1179_v42, %v868_v41 }
 0x360   :  { %v376_v45 = vpop.f32.mrf.mxu1 }
 0x361   :  { %v385_v46 = vadd.f32 %v867_v43, %v376_v45 }
 0x363   :  { %1368 = vtanh.f32 %v385_v46 }
 0x364   :  { %1370 = vtanh.f32 %v386_v44 }
 0x370   :  { %v1369_v47 = vpop.eup %1368 }
 0x371   :  { %v1371_v48 = vpop.eup %1370  ;;  %1212 = vmatprep.mubr.f32.mxu0 %v1369_v47 }
 0x372   :  { %1213 = vmatmul.mubr.f32.vlgmr.msra.gmra.mxu0 %v1371_v48 }
 0x373   :  { %1251 = vmatpush3.msra.mxu0 %v1417_v0 }
 0x374   :  { %1252 = vmatprep.subr.mxu0 %v1422_v1 }
 0x375   :  { %1253 = vmatpush3.msra.mxu0 %v1422_v1 }
 0x376   :  { %1254 = vmatprep.subr.mxu0 %v1431_v3 }
 0x377   :  { %1255 = vmatpush3.msra.mxu0 %v1431_v3 }
 0x378   :  { %1256 = vmatprep.subr.mxu0 %v1440_v4 }
 0x379   :  { %1257 = vmatpush3.msra.mxu0 %v1440_v4 }
 0x37a   :  { %1258 = vmatprep.subr.mxu0 %v1449_v5 }
 0x37b   :  { %1259 = vmatpush3.msra.mxu0 %v1449_v5 }
 0x37c   :  { %1260 = vmatprep.subr.mxu0 %v1458_v6 }
 0x37d   :  { %1261 = vmatpush3.msra.mxu0 %v1458_v6 }
 0x37e   :  { %1262 = vmatprep.subr.mxu0 %v1467_v7 }
 0x37f   :  { %1263 = vmatpush3.msra.mxu0 %v1467_v7 }
 0x380   :  { %1264 = vmatprep.subr.mxu0 %v1476_v8 }
 0x381   :  { %1265 = vmatpush3.msra.mxu0 %v1476_v8 }
 0x382   :  { %1266 = vmatprep.subr.mxu0 %v1485_v9 }
 0x383   :  { %1267 = vmatpush3.msra.mxu0 %v1485_v9 }
 0x384   :  { %1268 = vmatprep.subr.mxu0 %v1494_v10 }
 0x385   :  { %1269 = vmatpush3.msra.mxu0 %v1494_v10 }
 0x386   :  { %1270 = vmatprep.subr.mxu0 %v1503_v11 }
 0x387   :  { %1271 = vmatpush3.msra.mxu0 %v1503_v11 }
 0x388   :  { %1272 = vmatprep.subr.mxu0 %v1512_v12 }
 0x389   :  { %1273 = vmatpush3.msra.mxu0 %v1512_v12 }
 0x38a   :  { %1274 = vmatprep.subr.mxu0 %v1521_v13 }
 0x38b   :  { %1275 = vmatpush3.msra.mxu0 %v1521_v13 }
 0x38c   :  { %1276 = vmatprep.subr.mxu0 %v1530_v14 }
 0x38d   :  { %1277 = vmatpush3.msra.mxu0 %v1530_v14 }
 0x38e   :  { %1278 = vmatprep.subr.mxu0 %v1539_v15 }
 0x38f   :  { %1279 = vmatpush3.msra.mxu0 %v1539_v15 }
 0x390   :  { %1280 = vmatprep.subr.mxu0 %v1548_v16 }
 0x391   :  { %1281 = vmatpush3.msra.mxu0 %v1548_v16 }
 0x432   :  { %v1214_v50 = vpop.f32.mrf.mxu0 }
 0x433   :  { %v475_v52 = vadd.f32 %v1214_v50, %v870_v49 }
 0x434   :  { %v465_v53 = vpop.f32.mrf.mxu0 }
 0x435   :  { %v474_v54 = vadd.f32 %v869_v51, %v465_v53 }
 0x437   :  { %1372 = vtanh.f32 %v474_v54 }
 0x438   :  { %1374 = vtanh.f32 %v475_v52 }
 0x444   :  { %v1373_v55 = vpop.eup %1372 }
 0x445   :  { %v1375_v56 = vpop.eup %1374  ;;  %1247 = vmatprep.mubr.f32.mxu1 %v1373_v55 }
 0x446   :  { %1248 = vmatmul.mubr.f32.vlgmr.msra.gmra.mxu1 %v1375_v56 }
 0x447   :  { %1286 = vmatpush3.msra.mxu1 %v1417_v0 }
 0x448   :  { %1287 = vmatprep.subr.mxu1 %v1422_v1 }
 0x449   :  { %1288 = vmatpush3.msra.mxu1 %v1422_v1  ;;  %v774_v1 = vld [vmem:[%s1859_s2 + $0x78] sm:$0xff] }
 0x44a   :  { %1289 = vmatprep.subr.mxu1 %v1431_v3  ;;  %1320 = vmatprep.subr.mxu0 %v774_v1 }
 0x44b   :  { %1290 = vmatpush3.msra.mxu1 %v1431_v3  ;;  %v772_v3 = vld [vmem:[%s1859_s2 + $0x68] sm:$0xff] }
 0x44c   :  { %1291 = vmatprep.subr.mxu1 %v1440_v4 }
 0x44d   :  { %1292 = vmatpush3.msra.mxu1 %v1440_v4  ;;  %v771_v4 = vld [vmem:[%s1859_s2 + $0x60] sm:$0xff] }
 0x44e   :  { %1293 = vmatprep.subr.mxu1 %v1449_v5 }
 0x44f   :  { %1294 = vmatpush3.msra.mxu1 %v1449_v5  ;;  %v770_v5 = vld [vmem:[%s1859_s2 + $0x58] sm:$0xff] }
 0x450   :  { %1295 = vmatprep.subr.mxu1 %v1458_v6 }
 0x451   :  { %1296 = vmatpush3.msra.mxu1 %v1458_v6  ;;  %v769_v6 = vld [vmem:[%s1859_s2 + $0x50] sm:$0xff] }
 0x452   :  { %1297 = vmatprep.subr.mxu1 %v1467_v7 }
 0x453   :  { %1298 = vmatpush3.msra.mxu1 %v1467_v7  ;;  %v874_v7 = vld [vmem:[%s1858_s0 + $0x68] sm:$0xff] }
 0x454   :  { %1299 = vmatprep.subr.mxu1 %v1476_v8 }
 0x455   :  { %1300 = vmatpush3.msra.mxu1 %v1476_v8 }
 0x456   :  { %1301 = vmatprep.subr.mxu1 %v1485_v9 }
 0x457   :  { %1302 = vmatpush3.msra.mxu1 %v1485_v9  ;;  %v873_v9 = vld [vmem:[%s1858_s0 + $0x60] sm:$0xff] }
 0x458   :  { %1303 = vmatprep.subr.mxu1 %v1494_v10 }
 0x459   :  { %1304 = vmatpush3.msra.mxu1 %v1494_v10 }
 0x45a   :  { %1305 = vmatprep.subr.mxu1 %v1503_v11 }
 0x45b   :  { %1306 = vmatpush3.msra.mxu1 %v1503_v11 }
 0x45c   :  { %1307 = vmatprep.subr.mxu1 %v1512_v12 }
 0x45d   :  { %1308 = vmatpush3.msra.mxu1 %v1512_v12 }
 0x45e   :  { %1309 = vmatprep.subr.mxu1 %v1521_v13 }
 0x45f   :  { %1310 = vmatpush3.msra.mxu1 %v1521_v13 }
 0x460   :  { %1311 = vmatprep.subr.mxu1 %v1530_v14 }
 0x461   :  { %1312 = vmatpush3.msra.mxu1 %v1530_v14 }
 0x462   :  { %1313 = vmatprep.subr.mxu1 %v1539_v15 }
 0x463   :  { %1314 = vmatpush3.msra.mxu1 %v1539_v15  ;;  %v768_v15 = vld [vmem:[%s1859_s2 + $0x48] sm:$0xff] }
 0x464   :  { %1315 = vmatprep.subr.mxu1 %v1548_v16 }
 0x465   :  { %1316 = vmatpush3.msra.mxu1 %v1548_v16  ;;  %v767_v16 = vld [vmem:[%s1859_s2 + $0x40] sm:$0xff] }
 0x506   :  { %v1249_v58 = vpop.f32.mrf.mxu1 }
 0x507   :  { %v564_v60 = vadd.f32 %v1249_v58, %v872_v57 }
 0x508   :  { %v554_v61 = vpop.f32.mrf.mxu1 }
 0x509   :  { %v563_v62 = vadd.f32 %v871_v59, %v554_v61 }
 0x50b   :  { %1376 = vtanh.f32 %v563_v62 }
 0x50c   :  { %1378 = vtanh.f32 %v564_v60 }
 0x518   :  { %v1377_v63 = vpop.eup %1376 }
 0x519   :  { %v1379_v0 = vpop.eup %1378  ;;  %1282 = vmatprep.mubr.f32.mxu0 %v1377_v63 }
 0x51a   :  { %1283 = vmatmul.mubr.f32.vlgmr.msra.gmra.mxu0 %v1379_v0 }
 0x51b   :  { %1321 = vmatpush3.msra.mxu0 %v774_v1 }
 0x51c   :  { %1322 = vmatprep.subr.mxu0 %v773_v2 }
 0x51d   :  { %1323 = vmatpush3.msra.mxu0 %v773_v2 }
 0x51e   :  { %1324 = vmatprep.subr.mxu0 %v772_v3 }
 0x51f   :  { %1325 = vmatpush3.msra.mxu0 %v772_v3 }
 0x520   :  { %1326 = vmatprep.subr.mxu0 %v771_v4 }
 0x521   :  { %1327 = vmatpush3.msra.mxu0 %v771_v4 }
 0x522   :  { %1328 = vmatprep.subr.mxu0 %v770_v5 }
 0x523   :  { %1329 = vmatpush3.msra.mxu0 %v770_v5 }
 0x524   :  { %1330 = vmatprep.subr.mxu0 %v769_v6 }
 0x525   :  { %1331 = vmatpush3.msra.mxu0 %v769_v6 }
 0x526   :  { %1332 = vmatprep.subr.mxu0 %v768_v15 }
 0x527   :  { %1333 = vmatpush3.msra.mxu0 %v768_v15 }
 0x528   :  { %1334 = vmatprep.subr.mxu0 %v767_v16 }
 0x529   :  { %1335 = vmatpush3.msra.mxu0 %v767_v16 }
 0x52a   :  { %1336 = vmatprep.subr.mxu0 %v766_v17 }
 0x52b   :  { %1337 = vmatpush3.msra.mxu0 %v766_v17 }
 0x52c   :  { %1338 = vmatprep.subr.mxu0 %v765_v18 }
 0x52d   :  { %1339 = vmatpush3.msra.mxu0 %v765_v18 }
 0x52e   :  { %1340 = vmatprep.subr.mxu0 %v764_v19 }
 0x52f   :  { %1341 = vmatpush3.msra.mxu0 %v764_v19 }
 0x530   :  { %1342 = vmatprep.subr.mxu0 %v763_v20 }
 0x531   :  { %1343 = vmatpush3.msra.mxu0 %v763_v20 }
 0x532   :  { %1344 = vmatprep.subr.mxu0 %v762_v21 }
 0x533   :  { %1345 = vmatpush3.msra.mxu0 %v762_v21 }
 0x534   :  { %1346 = vmatprep.subr.mxu0 %v761_v22 }
 0x535   :  { %1347 = vmatpush3.msra.mxu0 %v761_v22 }
 0x536   :  { %1348 = vmatprep.subr.mxu0 %v760_v23 }
 0x537   :  { %1349 = vmatpush3.msra.mxu0 %v760_v23 }
 0x538   :  { %1350 = vmatprep.subr.mxu0 %v759_v24 }
 0x539   :  { %1351 = vmatpush3.msra.mxu0 %v759_v24 }
 0x5da   :  { %v1284_v8 = vpop.f32.mrf.mxu0 }
 0x5db   :  { %v653_v10 = vadd.f32 %v1284_v8, %v874_v7 }
 0x5dc   :  { %v643_v11 = vpop.f32.mrf.mxu0 }
 0x5dd   :  { %v652_v12 = vadd.f32 %v873_v9, %v643_v11 }
 0x5df   :  { %1380 = vtanh.f32 %v652_v12 }
 0x5e0   :  { %1382 = vtanh.f32 %v653_v10 }
 0x5ec   :  { %v1381_v13 = vpop.eup %1380 }
 0x5ed   :  { %v1383_v14 = vpop.eup %1382  ;;  %1317 = vmatprep.mubr.f32.mxu1 %v1381_v13 }
 0x5ee   :  { %1318 = vmatmul.mubr.f32.vlgmr.msra.gmra.mxu1 %v1383_v14 }
 0x6ae   :  { %v1319_v26 = vpop.f32.mrf.mxu1 }
 0x6af   :  { %v742_v28 = vadd.f32 %v1319_v26, %v876_v25 }
 0x6b0   :  { %v732_v29 = vpop.f32.mrf.mxu1 }
 0x6b1   :  { %v741_v30 = vadd.f32 %v875_v27, %v732_v29 }
 0x6b3   :  { %1384 = vtanh.f32 %v741_v30 }
 0x6b4   :  { %1386 = vtanh.f32 %v742_v28 }
 0x6c0   :  { %v1385_v31 = vpop.eup %1384 }
 0x6c1   :  { %v1387_v32 = vpop.eup %1386  ;;  %1352 = vmatprep.mubr.f32.mxu0 %v1385_v31 }
 0x6c2   :  { %1353 = vmatmul.mubr.f32.vlgmr.msra.gmra.mxu0 %v1387_v32 }
 0x782   :  { %v1354_v34 = vpop.f32.mrf.mxu0 }
 0x783   :  { %v854_v35 = vadd.f32 %v1354_v34, %v877_v33 }
 0x784   :  { %v848_v36 = vpop.f32.mrf.mxu0 }
 0x785   :  { %858 = vst [vmem:[%s1861_s4 + $0x8] sm:$0xff] %v854_v35  ;;  %v849_v37 = vadd.f32 %v877_v33, %v848_v36 }
 0x787   :  { %857 = vst [vmem:[%s1861_s4] sm:$0xff] %v849_v37 }

</bundles_post_ra>
